<compile_context>
chip_gen: v5e
topology: v5e:2x2
jax: 0.10.0
libtpu: 0.0.40
codegen_flags: <defaults>
</compile_context>

<pallas_src>
import math

import jax
import jax.numpy as jnp
from jax.experimental import pallas as pl
from jax.experimental.pallas import tpu as pltpu


def pos_enc_kernel(x_ref, pe_ref, o_ref):
    # x_ref : (TS, B, D) tile of the input
    # pe_ref: (TS, 1, D) matching rows of the positional-encoding buffer
    # Broadcast-add over batch on the VPU (promotes dtypes if they differ),
    # single cast on store.
    o_ref[...] = (x_ref[...] + pe_ref[...]).astype(o_ref.dtype)


def make_pe(d_model, max_len=5000, dtype=jnp.float32):
    """Deterministic buffer setup — mirrors PositionalEncoding.__init__."""
    position = jnp.arange(max_len, dtype=jnp.float32)[:, None]            # (max_len, 1)
    div_term = jnp.exp(
        jnp.arange(0, d_model, 2, dtype=jnp.float32) * (-math.log(10000.0) / d_model)
    )                                                                     # (d_model//2,)
    angles = position * div_term                                          # (max_len, d_model//2)
    pe = jnp.zeros((max_len, d_model), jnp.float32)
    pe = pe.at[:, 0::2].set(jnp.sin(angles))
    pe = pe.at[:, 1::2].set(jnp.cos(angles))
    # unsqueeze(0).transpose(0, 1) -> (max_len, 1, d_model)
    return pe[:, None, :].astype(dtype)


def _plan_tiles(S, B, D, x_itemsize, pe_itemsize,
                target_x_block_bytes=4 * 1024 * 1024,
                vmem_budget_bytes=24 * 1024 * 1024):
    """Pick the seq-tile size TS and a matching scoped-VMEM limit.

    (a) aim for ~4 MiB x blocks so DMA time dominates per-step overhead
        (measured knee for mem-bound adds is ~0.5-2 MiB; 4 MiB gives margin);
    (b) keep the double-buffered (x + out + pe) working set under
        `vmem_budget_bytes`, then request exactly that much scoped VMEM
        (plus margin) so the kernel compiles on every generation including
        v7x's 64 MiB VMEM without relying on the 16/32 MiB defaults.
    """
    row_x = max(1, B * D * x_itemsize)                  # one seq row of x (== out)
    row_pe = D * pe_itemsize
    per_pos = 2 * row_x + row_pe                        # x + out + pe per seq row

    ts = max(1, target_x_block_bytes // row_x)
    ts = min(ts, max(1, vmem_budget_bytes // (2 * per_pos)))   # x2: double buffering
    ts = int(min(ts, S))

    vmem_needed = 2 * ts * per_pos                      # both pipeline buffer copies
    vmem_limit = int(max(vmem_needed + (4 << 20), 16 << 20))   # margin; floor at 16 MiB
    return ts, vmem_limit


def positional_encoding(x, pe_full):
    """x: (S, B, D); pe_full: (max_len, 1, D). Returns x + pe_full[:S] in x.dtype."""
    S, B, D = x.shape
    assert pe_full.shape[0] >= S and pe_full.shape[1] == 1 and pe_full.shape[2] == D

    x_isz = jnp.dtype(x.dtype).itemsize
    pe_isz = jnp.dtype(pe_full.dtype).itemsize
    ts, vmem_limit = _plan_tiles(S, B, D, x_isz, pe_isz)
    grid = (pl.cdiv(S, ts),)

    cost = pl.CostEstimate(
        flops=S * B * D,
        transcendentals=0,
        bytes_accessed=2 * S * B * D * x_isz + S * D * pe_isz,  # x read + out write + pe read
    )

    return pl.pallas_call(
        pos_enc_kernel,
        out_shape=jax.ShapeDtypeStruct((S, B, D), x.dtype),
        grid_spec=pltpu.PrefetchScalarGridSpec(
            num_scalar_prefetch=0,
            grid=grid,
            in_specs=[
                pl.BlockSpec((ts, B, D), lambda i: (i, 0, 0)),  # x: TS seq rows
                pl.BlockSpec((ts, 1, D), lambda i: (i, 0, 0)),  # matching pe rows (un-broadcast)
            ],
            out_specs=pl.BlockSpec((ts, B, D), lambda i: (i, 0, 0)),
        ),
        compiler_params=pltpu.CompilerParams(
            dimension_semantics=("parallel",),
            vmem_limit_bytes=vmem_limit,
        ),
        cost_estimate=cost,
    )(x, pe_full)


if __name__ == "__main__":
    # Small shapes consistent with the module's forward: seq=8, batch=2, d_model=32.
    S, B, D = 8, 2, 32
    max_len = 64  # keep the demo buffer small (semantics identical to 5000)

    key = jax.random.PRNGKey(0)
    x = jax.random.normal(key, (S, B, D), dtype=jnp.float32)

    pe_full = make_pe(D, max_len=max_len)

    out = positional_encoding(x, pe_full)
    out = jax.block_until_ready(out)

    # Pure-JAX reference for correctness (exactly the module's forward).
    ref = x + pe_full[:S]
    assert out.shape == (S, B, D)
    assert out.dtype == x.dtype
    assert jnp.allclose(out, ref, atol=1e-6, rtol=1e-6)

    # Mixed-precision path: bf16 activations + f32 pe buffer, promotion handled
    # in-kernel, output kept in x.dtype (standard mixed-precision convention).
    x_bf16 = x.astype(jnp.bfloat16)
    out_bf16 = jax.block_until_ready(positional_encoding(x_bf16, pe_full))
    ref_bf16 = (x_bf16.astype(jnp.float32) + pe_full[:S]).astype(jnp.bfloat16)
    assert out_bf16.dtype == jnp.bfloat16
    assert jnp.allclose(out_bf16.astype(jnp.float32),
                        ref_bf16.astype(jnp.float32), atol=1e-2, rtol=1e-2)

    print("KERNEL_OK")
</pallas_src>

<mosaic_0001>
module attributes {stable_mosaic.version = 11 : i64} {
  func.func @pos_enc_kernel(%arg0: i32, %arg1: memref<8x2x32xf32, #tpu.memory_space<vmem>>, %arg2: memref<8x1x32xf32, #tpu.memory_space<vmem>>, %arg3: memref<8x2x32xf32, #tpu.memory_space<vmem>>) attributes {dimension_semantics = [#tpu.dimension_semantics<parallel>], iteration_bounds = array<i64: 1>, scalar_prefetch = 0 : i64, scratch_operands = 0 : i64, tpu.core_type = #tpu.core_type<tc>, window_params = [{transform_indices = @transform_0, window_bounds = array<i64: 8, 2, 32>}, {transform_indices = @transform_1, window_bounds = array<i64: 8, 1, 32>}, {transform_indices = @transform_2, window_bounds = array<i64: 8, 2, 32>}]} {
    %c0 = arith.constant 0 : index
    %c0_0 = arith.constant 0 : index
    %c0_1 = arith.constant 0 : index
    %0 = vector.load %arg1[%c0, %c0_0, %c0_1] : memref<8x2x32xf32, #tpu.memory_space<vmem>>, vector<8x2x32xf32>
    %c0_2 = arith.constant 0 : index
    %c0_3 = arith.constant 0 : index
    %c0_4 = arith.constant 0 : index
    %1 = vector.load %arg2[%c0_2, %c0_3, %c0_4] : memref<8x1x32xf32, #tpu.memory_space<vmem>>, vector<8x1x32xf32>
    %2 = vector.broadcast %1 : vector<8x1x32xf32> to vector<8x2x32xf32>
    %3 = arith.addf %0, %2 : vector<8x2x32xf32>
    %c0_5 = arith.constant 0 : index
    %c0_6 = arith.constant 0 : index
    %c0_7 = arith.constant 0 : index
    %4 = vector.load %arg3[%c0_5, %c0_6, %c0_7] : memref<8x2x32xf32, #tpu.memory_space<vmem>>, vector<8x2x32xf32>
    tpu.vector_store %arg3[%c0_5, %c0_6, %c0_7], %3 {strides = array<i32>} : memref<8x2x32xf32, #tpu.memory_space<vmem>>, vector<8x2x32xf32>,
    return
  }
  func.func @transform_0(%arg0: i32) -> (i32, i32, i32) {
    %c0_i32 = arith.constant 0 : i32
    %c0_i32_0 = arith.constant 0 : i32
    %c0_i32_1 = arith.constant 0 : i32
    return %arg0, %c0_i32, %c0_i32_0 : i32, i32, i32
  }
  func.func @transform_1(%arg0: i32) -> (i32, i32, i32) {
    %c0_i32 = arith.constant 0 : i32
    %c0_i32_0 = arith.constant 0 : i32
    %c0_i32_1 = arith.constant 0 : i32
    return %arg0, %c0_i32, %c0_i32_0 : i32, i32, i32
  }
  func.func @transform_2(%arg0: i32) -> (i32, i32, i32) {
    %c0_i32 = arith.constant 0 : i32
    %c0_i32_0 = arith.constant 0 : i32
    %c0_i32_1 = arith.constant 0 : i32
    return %arg0, %c0_i32, %c0_i32_0 : i32, i32, i32
  }
}

</mosaic_0001>

<bundles_post_ra>
// kernel: tpu_custom_call.1
= control target key start
LH: loop header
LB: loop body
LE: loop exit
PB: predicated region body
PF: predicated region fallthrough
CT: control target
= control target key end

     0   :  { %vm60_vm0 = vcmask 254976   ;;  %s201_s0 = inlined_call_operand.vmem [shape: f32[8,2,32], index: 0, kind: input, shape index: {}]   ;;  %s202_s1 = inlined_call_operand.vmem [shape: f32[64,1,32], index: 1, kind: input, shape index: {}]   ;;  %s203_s2 = inlined_call_operand.hbm [shape: f32[8,2,32], index: 2, kind: output, shape index: {}]  }
   0x1   :  { %v12_v0 = vld [vmem:[%s201_s0] sm:$0x3]  ;;  %v13_v2 = vld [vmem:[%s201_s0 + $0x2] sm:$0x3]  ;;  %v14_v5 = vld [vmem:[%s201_s0 + $0x4] sm:$0x3] }
   0x2   :  { %v90_v1 = vld [vmem:[%s202_s1] ss:$0 sm:$0xff]  ;;  %v91_v4 = vld [vmem:[%s202_s1 + $0x1] ss:$0 sm:$0xff]  ;;  %v92_v6 = vld [vmem:[%s202_s1 + $0x2] ss:$0 sm:$0xff] }
   0x3   :  { %v52_v3 = vadd.f32 %v90_v1, %v12_v0  ;;  %v15_v7 = vld [vmem:[%s201_s0 + $0x6] sm:$0x3]  ;;  %v53_v8 = vadd.f32 %v91_v4, %v13_v2  ;;  %v93_v9 = vld [vmem:[%s202_s1 + $0x3] ss:$0 sm:$0xff]  ;;  %v16_v10 = vld [vmem:[%s201_s0 + $0x8] sm:$0x3]  ;;  %v54_v11 = vadd.f32 %v92_v6, %v14_v5 }
   0x4   :  { %v94_v12 = vld [vmem:[%s202_s1 + $0x4] ss:$0 sm:$0xff]  ;;  %v17_v13 = vld [vmem:[%s201_s0 + $0xa] sm:$0x3]  ;;  %v55_v14 = vadd.f32 %v93_v9, %v15_v7  ;;  %v95_v15 = vld [vmem:[%s202_s1 + $0x5] ss:$0 sm:$0xff] }
   0x5   :  { %61 = vst.msk [vmem:[#allocation2] sm:$0x3] %vm60_vm0, %v52_v3  ;;  %v56_v16 = vadd.f32 %v94_v12, %v16_v10  ;;  %v18_v17 = vld [vmem:[%s201_s0 + $0xc] sm:$0x3]  ;;  %v57_v18 = vadd.f32 %v95_v15, %v17_v13  ;;  %v96_v19 = vld [vmem:[%s202_s1 + $0x6] ss:$0 sm:$0xff] }
   0x6   :  { %62 = vst.msk [vmem:[#allocation2 + $0x2] sm:$0x3] %vm60_vm0, %v53_v8  ;;  %v19_v20 = vld [vmem:[%s201_s0 + $0xe] sm:$0x3]  ;;  %v97_v21 = vld [vmem:[%s202_s1 + $0x7] ss:$0 sm:$0xff]  ;;  %v58_v22 = vadd.f32 %v96_v19, %v18_v17 }
   0x7   :  { %63 = vst.msk [vmem:[#allocation2 + $0x4] sm:$0x3] %vm60_vm0, %v54_v11 }
   0x8   :  { %64 = vst.msk [vmem:[#allocation2 + $0x6] sm:$0x3] %vm60_vm0, %v55_v14 }
   0x9   :  { %65 = vst.msk [vmem:[#allocation2 + $0x8] sm:$0x3] %vm60_vm0, %v56_v16 }
   0xa   :  { %66 = vst.msk [vmem:[#allocation2 + $0xa] sm:$0x3] %vm60_vm0, %v57_v18 }
   0xb   :  { %7 = vsyncpa [#allocation3], 0  ;;  %s124_s13 = smov [#allocation2]   ;;  %s75_s17 = sshll.u32 %s203_s2, 4  ;;  %v59_v23 = vadd.f32 %v97_v21, %v19_v20  ;;  %67 = vst.msk [vmem:[#allocation2 + $0xc] sm:$0x3] %vm60_vm0, %v58_v22  ;;  %s76_s17 = int_to_ptr.hbm [resolvable:$true] %s75_s17 }
   0xc   :  { %s73_s14 = sshll.u32 %s124_s13, 4  ;;  %s125_s0 = smov 32   ;;  %s74_s14 = int_to_ptr.vmem [resolvable:$true] %s73_s14 }
   0xd   :  { %68 = vst.msk [vmem:[#allocation2 + $0xe] sm:$0x3] %vm60_vm0, %v59_v23  ;;  %s126_s18 = smov 2  }
   0xe   :  { %81 = dma.vmem_to_hbm [thread:$0]  %s74_s14, 256, %s76_s17, [#allocation3], %s125_s0, %s125_s0, %s126_s18  }
   0xf   :  { %122 = dma.done.wait [#allocation3], 256  }
  0x10   :  { %123 = vsyncadd [#allocation3], 4294967040 }
  0x11   :  { %86 = vsyncpa [#allocation3], 1 }

</bundles_post_ra>
